<compile_context>
chip_gen: v7x
topology: tpu7x:2x2x1
jax: 0.10.0
libtpu: 0.0.40
codegen_flags: <defaults>
</compile_context>

<pallas_src>
import functools

import jax
import jax.numpy as jnp
from jax.experimental import pallas as pl
from jax.experimental.pallas import tpu as pltpu

LANES = 128
SUBLANES = 8


def _round_up(x, m):
    return ((x + m - 1) // m) * m


def _focal_bce_kernel(pred_ref, tgt_ref, part_ref, *, gamma, gamma_int, alpha,
                      binary_targets, rows, tile_rows, need_mask):
    p = pred_ref[...].astype(jnp.float32)
    t = tgt_ref[...].astype(jnp.float32)

    if binary_targets:
        # Exact only for t in {0,1}: one log instead of 2 logs + 1 exp.
        p_top = jnp.where(t > 0.5, p, 1.0 - p)
        logpt = jnp.maximum(jnp.log(p_top), -100.0)
    else:
        # BCELoss(reduction='none') — PyTorch clamps each log term at -100.
        log_p = jnp.maximum(jnp.log(p), -100.0)
        log_1mp = jnp.maximum(jnp.log(1.0 - p), -100.0)
        logpt = t * log_p + (1.0 - t) * log_1mp          # logpt = -bce
        p_top = jnp.exp(logpt)

    one_m = 1.0 - p_top
    if gamma_int is not None:                            # static small-int gamma
        if gamma_int == 0:
            mod = jnp.ones_like(one_m)
        else:
            mod = one_m
            for _ in range(gamma_int - 1):               # gamma=2 -> one extra mul
                mod = mod * one_m
    else:
        mod = one_m ** jnp.float32(gamma)
    focal = -mod * logpt

    if alpha != 1.0:
        factor = jnp.where(t > 0.5, jnp.float32(alpha),
                           jnp.where(t < 0.5, jnp.float32(1.0 / alpha),
                                     jnp.float32(1.0)))
        focal = focal * factor

    if need_mask:
        # Last block overhangs the array: OOB rows hold unspecified data that
        # may have produced NaN/Inf above.  Select-to-zero (NOT multiply) so
        # nothing propagates into the partial sum.
        i = pl.program_id(0)
        valid = rows - i * tile_rows          # >= tile_rows for non-last blocks
        row_ids = jax.lax.broadcasted_iota(jnp.int32, (tile_rows, 1), 0)
        focal = jnp.where(row_ids < valid, focal, 0.0)

    # vreg-shaped partial sum: (tile_rows,128) -> per-vreg VALU adds -> (8,128)
    part_ref[...] = focal.reshape(-1, SUBLANES, LANES).sum(axis=0)[None]


def focal_bce(output, target, *, gamma=2.0, alpha=1.0, reduction='mean',
              binary_targets=False, tile_rows=8192):
    """FocalBCE forward. output/target: same shape, any rank, probabilities.

    binary_targets=True enables an exact-for-{0,1}-labels 1-transcendental
    path; keep False for soft labels.
    """
    assert output.shape == target.shape
    total = int(output.size)
    assert total > 0
    if reduction not in ('mean', 'sum'):
        # TODO(synk): reduction='none' (per-element output) not implemented.
        raise ValueError("reduction must be 'mean' or 'sum'")

    out_flat = output.reshape(-1)
    tgt_flat = target.reshape(-1)
    pad = (-total) % LANES
    if pad:
        # Fallback only when total isn't lane-aligned: pad with (p=1, t=1),
        # which contributes exactly zero focal loss.  (Lane-aligned inputs take
        # the copy-free reshape path.)
        out_flat = jnp.pad(out_flat, (0, pad), constant_values=1)
        tgt_flat = jnp.pad(tgt_flat, (0, pad), constant_values=1)
    rows = (total + pad) // LANES

    # Tile selection: big lane-dense blocks; shrink for small inputs; keep a
    # multiple of 32 rows so bf16/int8 native sublane packing is respected and
    # the in-kernel (.., 8, 128) reshape is always valid.
    tile_rows = _round_up(max(32, min(int(tile_rows), rows)), 32)
    nb = -(-rows // tile_rows)                # only the LAST block may be partial
    need_mask = (rows % tile_rows) != 0

    out2d = out_flat.reshape(rows, LANES)     # free bitcast, no HBM copy
    tgt2d = tgt_flat.reshape(rows, LANES)

    g = float(gamma)
    gamma_int = int(g) if (g.is_integer() and 0 <= g <= 8) else None

    kernel = functools.partial(
        _focal_bce_kernel, gamma=g, gamma_int=gamma_int, alpha=float(alpha),
        binary_targets=bool(binary_targets), rows=rows, tile_rows=tile_rows,
        need_mask=need_mask)

    in_bytes = tile_rows * LANES * (out2d.dtype.itemsize + tgt2d.dtype.itemsize)
    # 2 pipeline buffers per input + generous headroom; safe on every gen.
    vmem_limit = int(min(max(2 * in_bytes + (8 << 20), 32 << 20), 64 << 20))

    cost = pl.CostEstimate(
        flops=16 * total,
        transcendentals=(1 if binary_targets else 3) * total,
        bytes_accessed=total * (out2d.dtype.itemsize + tgt2d.dtype.itemsize)
                       + nb * SUBLANES * LANES * 4)

    in_spec = pl.BlockSpec((tile_rows, LANES), lambda i: (i, 0))
    partials = pl.pallas_call(
        kernel,
        out_shape=jax.ShapeDtypeStruct((nb, SUBLANES, LANES), jnp.float32),
        grid_spec=pltpu.PrefetchScalarGridSpec(
            num_scalar_prefetch=0,
            grid=(nb,),
            in_specs=[in_spec, in_spec],
            # Each step writes its OWN partial block -> axis is data-parallel
            # (megacore-shardable on v7x); no cross-step accumulator needed.
            out_specs=pl.BlockSpec((1, SUBLANES, LANES), lambda i: (i, 0, 0)),
        ),
        compiler_params=pltpu.CompilerParams(
            dimension_semantics=("parallel",),
            vmem_limit_bytes=vmem_limit),
        cost_estimate=cost,
    )(out2d, tgt2d)

    total_sum = jnp.sum(partials)
    if reduction == 'mean':
        return total_sum / jnp.float32(total)    # true element count
    return total_sum


def _focal_bce_ref(output, target, gamma=2.0, alpha=1.0):
    p = output.astype(jnp.float32)
    t = target.astype(jnp.float32)
    log_p = jnp.maximum(jnp.log(p), -100.0)
    log_1mp = jnp.maximum(jnp.log(1.0 - p), -100.0)
    logpt = t * log_p + (1.0 - t) * log_1mp
    p_top = jnp.exp(logpt)
    focal = -((1.0 - p_top) ** gamma) * logpt
    factor = jnp.where(t > 0.5, alpha, jnp.where(t < 0.5, 1.0 / alpha, 1.0))
    return jnp.mean(focal * factor)


if __name__ == "__main__":
    key = jax.random.PRNGKey(0)
    k1, k2 = jax.random.split(key)

    # 1) NCHW probabilities with binary targets (lane-aligned total, no pad).
    x = jax.nn.sigmoid(jax.random.normal(k1, (2, 4, 16, 16), dtype=jnp.float32))
    y = (jax.random.uniform(k2, (2, 4, 16, 16)) > 0.5).astype(jnp.float32)
    loss = jax.block_until_ready(focal_bce(x, y, gamma=2.0, alpha=1.0))
    ref = _focal_bce_ref(x, y, gamma=2.0, alpha=1.0)
    assert jnp.allclose(loss, ref, rtol=1e-5, atol=1e-6), (loss, ref)

    # 1b) binary-target fast path (exact for t in {0,1}).
    loss_b = jax.block_until_ready(focal_bce(x, y, binary_targets=True))
    assert jnp.allclose(loss_b, ref, rtol=1e-5, atol=1e-6), (loss_b, ref)

    # 2) Non-multiple-of-128 total (pad fallback) and non-trivial alpha.
    x2 = jax.nn.sigmoid(jax.random.normal(k1, (3, 5, 7, 9), dtype=jnp.float32))
    y2 = (jax.random.uniform(k2, (3, 5, 7, 9)) > 0.5).astype(jnp.float32)
    loss2 = jax.block_until_ready(focal_bce(x2, y2, gamma=2.0, alpha=0.75))
    ref2 = _focal_bce_ref(x2, y2, gamma=2.0, alpha=0.75)
    assert jnp.allclose(loss2, ref2, rtol=1e-5, atol=1e-6), (loss2, ref2)

    # 3) Multi-block grid with a partial (masked) last block and 'sum'.
    x3 = jax.nn.sigmoid(jax.random.normal(k1, (4, 8, 32, 32), dtype=jnp.float32))
    y3 = (jax.random.uniform(k2, (4, 8, 32, 32)) > 0.5).astype(jnp.float32)
    loss3 = jax.block_until_ready(
        focal_bce(x3, y3, gamma=2.0, alpha=1.0, reduction='sum', tile_rows=96))
    ref3 = _focal_bce_ref(x3, y3, gamma=2.0, alpha=1.0) * x3.size
    assert jnp.allclose(loss3, ref3, rtol=1e-5, atol=1e-4), (loss3, ref3)

    print("KERNEL_OK")
</pallas_src>

<mosaic_0001>
module attributes {stable_mosaic.version = 11 : i64} {
  func.func @_focal_bce_kernel(%arg0: i32, %arg1: memref<32x128xf32, #tpu.memory_space<vmem>>, %arg2: memref<32x128xf32, #tpu.memory_space<vmem>>, %arg3: memref<1x8x128xf32, #tpu.memory_space<vmem>>) attributes {dimension_semantics = [#tpu.dimension_semantics<parallel>], iteration_bounds = array<i64: 1>, scalar_prefetch = 0 : i64, scratch_operands = 0 : i64, tpu.core_type = #tpu.core_type<tc>, window_params = [{transform_indices = @transform_0, window_bounds = array<i64: 32, 128>}, {transform_indices = @transform_1, window_bounds = array<i64: 32, 128>}, {transform_indices = @transform_2, window_bounds = array<i64: 1, 8, 128>}]} {
    %c0 = arith.constant 0 : index
    %c0_0 = arith.constant 0 : index
    %0 = vector.load %arg1[%c0, %c0_0] : memref<32x128xf32, #tpu.memory_space<vmem>>, vector<32x128xf32>
    %c0_1 = arith.constant 0 : index
    %c0_2 = arith.constant 0 : index
    %1 = vector.load %arg2[%c0_1, %c0_2] : memref<32x128xf32, #tpu.memory_space<vmem>>, vector<32x128xf32>
    %2 = math.log %0 : vector<32x128xf32>
    %cst = arith.constant -1.000000e+02 : f32
    %3 = vector.broadcast %cst : f32 to vector<32x128xf32>
    %4 = arith.maximumf %2, %3 : vector<32x128xf32>
    %cst_3 = arith.constant 1.000000e+00 : f32
    %5 = vector.broadcast %cst_3 : f32 to vector<32x128xf32>
    %6 = arith.subf %5, %0 : vector<32x128xf32>
    %7 = math.log %6 : vector<32x128xf32>
    %cst_4 = arith.constant -1.000000e+02 : f32
    %8 = vector.broadcast %cst_4 : f32 to vector<32x128xf32>
    %9 = arith.maximumf %7, %8 : vector<32x128xf32>
    %10 = arith.mulf %1, %4 : vector<32x128xf32>
    %cst_5 = arith.constant 1.000000e+00 : f32
    %11 = vector.broadcast %cst_5 : f32 to vector<32x128xf32>
    %12 = arith.subf %11, %1 : vector<32x128xf32>
    %13 = arith.mulf %12, %9 : vector<32x128xf32>
    %14 = arith.addf %10, %13 : vector<32x128xf32>
    %15 = math.exp %14 : vector<32x128xf32>
    %cst_6 = arith.constant 1.000000e+00 : f32
    %16 = vector.broadcast %cst_6 : f32 to vector<32x128xf32>
    %17 = arith.subf %16, %15 : vector<32x128xf32>
    %18 = arith.mulf %17, %17 : vector<32x128xf32>
    %cst_7 = arith.constant 0.000000e+00 : f32
    %19 = vector.broadcast %cst_7 : f32 to vector<32x128xf32>
    %20 = arith.subf %19, %18 : vector<32x128xf32>
    %21 = arith.mulf %20, %14 : vector<32x128xf32>
    %c32_i32 = arith.constant 32 : i32
    %22 = arith.muli %arg0, %c32_i32 : i32
    %c16_i32 = arith.constant 16 : i32
    %23 = arith.subi %c16_i32, %22 : i32
    %24 = tpu.iota {dimensions = array<i32: 0>} : vector<32x1xi32>
    %25 = vector.broadcast %23 : i32 to vector<32x1xi32>
    %26 = arith.cmpi slt, %24, %25 : vector<32x1xi32>
    %cst_8 = arith.constant 0.000000e+00 : f32
    %27 = vector.shape_cast %26 : vector<32x1xi1> to vector<32x1xi1>
    %28 = vector.broadcast %27 : vector<32x1xi1> to vector<32x128xi1>
    %29 = vector.broadcast %cst_8 : f32 to vector<32x128xf32>
    %30 = arith.select %28, %21, %29 : vector<32x128xi1>, vector<32x128xf32>
    %31 = vector.shape_cast %30 : vector<32x128xf32> to vector<4x8x128xf32>
    %cst_9 = arith.constant dense<0.000000e+00> : vector<8x128xf32>
    %32 = vector.multi_reduction <add>, %31, %cst_9 [0] : vector<4x8x128xf32> to vector<8x128xf32>
    %33 = vector.shape_cast %32 : vector<8x128xf32> to vector<1x8x128xf32>
    %c0_10 = arith.constant 0 : index
    %c0_11 = arith.constant 0 : index
    %c0_12 = arith.constant 0 : index
    %34 = vector.load %arg3[%c0_10, %c0_11, %c0_12] : memref<1x8x128xf32, #tpu.memory_space<vmem>>, vector<1x8x128xf32>
    tpu.vector_store %arg3[%c0_10, %c0_11, %c0_12], %33 {strides = array<i32>} : memref<1x8x128xf32, #tpu.memory_space<vmem>>, vector<1x8x128xf32>,
    return
  }
  func.func @transform_0(%arg0: i32) -> (i32, i32) {
    %c0_i32 = arith.constant 0 : i32
    %c0_i32_0 = arith.constant 0 : i32
    return %arg0, %c0_i32 : i32, i32
  }
  func.func @transform_1(%arg0: i32) -> (i32, i32) {
    %c0_i32 = arith.constant 0 : i32
    %c0_i32_0 = arith.constant 0 : i32
    return %arg0, %c0_i32 : i32, i32
  }
  func.func @transform_2(%arg0: i32) -> (i32, i32, i32) {
    %c0_i32 = arith.constant 0 : i32
    %c0_i32_0 = arith.constant 0 : i32
    %c0_i32_1 = arith.constant 0 : i32
    return %arg0, %c0_i32, %c0_i32_0 : i32, i32, i32
  }
}

</mosaic_0001>

<bundles_post_ra>
// kernel: tpu_custom_call.1
= control target key start
LH: loop header
LB: loop body
LE: loop exit
PB: predicated region body
PF: predicated region fallthrough
CT: control target
= control target key end

     0   :  { %7 = vsyncpa [#allocation3], 0  ;;  %s305_s0 = inlined_call_operand.hbm [shape: f32[16,128], index: 0, kind: input, shape index: {}]   ;;  %s306_s1 = inlined_call_operand.hbm [shape: f32[16,128], index: 1, kind: input, shape index: {}]   ;;  %s307_s2 = inlined_call_operand.hbm [shape: f32[1,8,128], index: 2, kind: output, shape index: {}]  }
   0x1   :  { %8 = vsyncpa [#allocation6], 0 }
   0x2   :  { %9 = vsyncpa [#allocation4], 0 }
   0x3   :  { %14 = vsyncadd [#allocation3], 256  ;;  %s249_s9 = smov [#allocation2]   ;;  %s177_s13 = scalar_lea.hbm %s305_s0, 256 }
   0x4   :  { %s15_s10 = sshll.u32 %s249_s9, 4  ;;  %p178_p0 = scmp.ne.s32.totalorder %s305_s0, %s177_s13  ;;  %s16_s10 = int_to_ptr.vmem [resolvable:$true] %s15_s10 }
   0x5   :  { %p181_p1 = scmp.lt.u32.totalorder %s177_s13, %s305_s0 }
   0x7   :  { %p183_p2 = pnand %p181_p1, %p178_p0 }
   0x9   :  { %186 = shalt.err (!%p183_p2)
}
   0xa   :  { %s187_s18 = scalar_lea.vmem %s16_s10, 256  ;;  %s191_s19 = scalar_lea.vmem %s16_s10, 512 }
   0xb   :  { %p188_p3 = scmp.ne.s32.totalorder %s16_s10, %s187_s18  ;;  %p192_p4 = scmp.lt.s32.totalorder %s16_s10, %s16_s10 }
   0xc   :  { %p193_p5 = scmp.lt.s32.totalorder %s191_s19, %s187_s18 }
   0xe   :  { %p194_p6 = por %p193_p5, %p192_p4 }
  0x10   :  { %p195_p7 = pnand %p194_p6, %p188_p3 }
  0x12   :  { %198 = shalt.err (!%p195_p7)
}
  0x13   :  { %s250_s20 = smov 128   ;;  %s251_s21 = smov 8  }
  0x14   :  { %21 = dma.hbm_to_vmem [thread:$0]  %s305_s0, 256, %s16_s10, [#allocation3], %s250_s20, %s250_s20, %s251_s21  }
  0x15   :  { %26 = vsyncadd [#allocation6], 256  ;;  %s252_s24 = smov [#allocation5]   ;;  %s199_s28 = scalar_lea.hbm %s306_s1, 256 }
  0x16   :  { %s27_s25 = sshll.u32 %s252_s24, 4  ;;  %p200_p8 = scmp.ne.s32.totalorder %s306_s1, %s199_s28  ;;  %s28_s25 = int_to_ptr.vmem [resolvable:$true] %s27_s25 }
  0x17   :  { %p203_p9 = scmp.lt.u32.totalorder %s199_s28, %s306_s1 }
  0x19   :  { %p205_p10 = pnand %p203_p9, %p200_p8 }
  0x1b   :  { %208 = shalt.err (!%p205_p10)
}
  0x1c   :  { %s209_s5 = scalar_lea.vmem %s28_s25, 256  ;;  %s213_s0 = scalar_lea.vmem %s28_s25, 512 }
  0x1d   :  { %p210_p11 = scmp.ne.s32.totalorder %s28_s25, %s209_s5  ;;  %p214_p12 = scmp.lt.s32.totalorder %s28_s25, %s28_s25 }
  0x1e   :  { %p215_p13 = scmp.lt.s32.totalorder %s213_s0, %s209_s5 }
  0x20   :  { %p216_p0 = por %p215_p13, %p214_p12 }
  0x22   :  { %p217_p1 = pnand %p216_p0, %p210_p11 }
  0x24   :  { %220 = shalt.err (!%p217_p1)
}
  0x25   :  { %33 = dma.hbm_to_vmem [thread:$0]  %s306_s1, 256, %s28_s25, [#allocation6], %s250_s20, %s250_s20, %s251_s21  }
  0x26   :  { %243 = dma.done.wait [#allocation3], 512  }
  0x27   :  { %244 = vsyncadd [#allocation3], 4294966784 }
  0x28   :  { %245 = dma.done.wait [#allocation6], 512  }
  0x29   :  { %246 = vsyncadd [#allocation6], 4294966784  ;;  %v40_v0 = vld [vmem:[#allocation2] sm:$0xff]  ;;  %v41_v1 = vld [vmem:[#allocation2 + $0x8] sm:$0xff]  ;;  %s253_s1 = smov [#allocation7]  }
  0x2a   :  { %165 = vlog2.f32 %v40_v0  ;;  %v60_v2 = vsub.f32 1.0, %v40_v0  ;;  %v61_v3 = vsub.f32 1.0, %v41_v1  ;;  %v44_v5 = vld [vmem:[#allocation5] sm:$0xff]  ;;  %v45_v7 = vld [vmem:[#allocation5 + $0x8] sm:$0xff]  ;;  %s150_s8 = sshll.u32 %s253_s1, 4  ;;  %s151_s8 = int_to_ptr.vmem [resolvable:$true] %s150_s8 }
  0x2b   :  { %167 = vlog2.f32 %v41_v1  ;;  %v80_v14 = vsub.f32 1.0, %v44_v5  ;;  %v81_v17 = vsub.f32 1.0, %v45_v7  ;;  %s221_s9 = scalar_lea.vmem %s151_s8, 128  ;;  %p226_p3 = scmp.lt.s32.totalorder %s151_s8, %s151_s8 }
  0x2c   :  { %169 = vlog2.f32 %v60_v2  ;;  %p222_p2 = scmp.ne.s32.totalorder %s151_s8, %s221_s9  ;;  %p227_p4 = scmp.lt.s32.totalorder %s221_s9, %s221_s9 }
  0x2d   :  { %171 = vlog2.f32 %v61_v3 }
  0x2e   :  { %p228_p5 = por %p227_p4, %p226_p3 }
  0x30   :  { %p229_p6 = pnand %p228_p5, %p222_p2 }
  0x34   :  { %v166_v4 = vpop.eup %165 }
  0x35   :  { %v168_v6 = vpop.eup %167  ;;  %v49_v8 = vmul.f32 0.6931472, %v166_v4 }
  0x36   :  { %v170_v9 = vpop.eup %169  ;;  %v51_v10 = vmul.f32 0.6931472, %v168_v6 }
  0x37   :  { %v172_v11 = vpop.eup %171  ;;  %v56_v12 = vmax.f32 %v49_v8, -100.0  ;;  %v65_v13 = vmul.f32 0.6931472, %v170_v9 }
  0x38   :  { %v57_v15 = vmax.f32 %v51_v10, -100.0  ;;  %v67_v16 = vmul.f32 0.6931472, %v172_v11 }
  0x39   :  { %v72_v18 = vmax.f32 %v65_v13, -100.0  ;;  %v76_v19 = vmul.f32 %v56_v12, %v44_v5 }
  0x3a   :  { %v73_v20 = vmax.f32 %v67_v16, -100.0  ;;  %v77_v21 = vmul.f32 %v57_v15, %v45_v7 }
  0x3b   :  { %v84_v22 = vmul.f32 %v80_v14, %v72_v18 }
  0x3c   :  { %v85_v23 = vmul.f32 %v81_v17, %v73_v20 }
  0x3d   :  { %v88_v24 = vadd.f32 %v84_v22, %v76_v19 }
  0x3e   :  { %v89_v25 = vadd.f32 %v85_v23, %v77_v21 }
  0x3f   :  { %v92_v26 = vmul.f32 1.442695, %v88_v24 }
  0x40   :  { %v94_v27 = vmul.f32 1.442695, %v89_v25 }
  0x41   :  { %173 = vpow2.f32 %v92_v26 }
  0x42   :  { %175 = vpow2.f32 %v94_v27 }
  0x4b   :  { %v174_v28 = vpop.eup %173 }
  0x4c   :  { %v176_v29 = vpop.eup %175  ;;  %v100_v30 = vsub.f32 1.0, %v174_v28 }
  0x4d   :  { %v101_v31 = vsub.f32 1.0, %v176_v29 }
  0x4e   :  { %v104_v32 = vmul.f32 %v100_v30, %v100_v30 }
  0x4f   :  { %v105_v33 = vmul.f32 %v101_v31, %v101_v31 }
  0x50   :  { %v108_v34 = vsub.f32 0.0, %v104_v32 }
  0x51   :  { %v109_v35 = vsub.f32 0.0, %v105_v33 }
  0x52   :  { %v112_v36 = vmul.f32 %v108_v34, %v88_v24 }
  0x53   :  { %v113_v37 = vmul.f32 %v109_v35, %v89_v25 }
  0x55   :  { %v140_v38 = vadd.f32 %v113_v37, %v112_v36 }
  0x57   :  { %143 = vst [vmem:[#allocation7] sm:$0xff] %v140_v38 }
  0x58   :  { %232 = shalt.err (!%p229_p6)
}
  0x59   :  { %s233_s12 = scalar_lea.hbm %s307_s2, 128 }
  0x5a   :  { %p234_p7 = scmp.ne.s32.totalorder %s307_s2, %s233_s12  ;;  %p237_p8 = scmp.lt.u32.totalorder %s233_s12, %s307_s2 }
  0x5c   :  { %p239_p9 = pnand %p237_p8, %p234_p7 }
  0x5e   :  { %242 = shalt.err (!%p239_p9)
}
  0x5f   :  { %153 = dma.vmem_to_hbm [thread:$0]  %s151_s8, 128, %s307_s2, [#allocation4]  }
  0x60   :  { %247 = dma.done.wait [#allocation4], 128  }
  0x61   :  { %248 = vsyncadd [#allocation4], 4294967168 }
  0x62   :  { %157 = vsyncpa [#allocation3], 1 }
  0x63   :  { %158 = vsyncpa [#allocation6], 1 }
  0x64   :  { %159 = vsyncpa [#allocation4], 1 }

</bundles_post_ra>
